<compile_context>
chip_gen: v6e
topology: v6e:2x2x1
jax: 0.10.0
libtpu: 0.0.40
codegen_flags: <defaults>
</compile_context>

<pallas_src>
import functools

import jax
import jax.numpy as jnp
from jax import lax
from jax.experimental import pallas as pl
from jax.experimental.pallas import tpu as pltpu


def _fact_checking_loss_kernel(ps_ref, sc_ref, cls_ref, out_ref,
                               acc_rank_ref, acc_bce_ref,
                               *, alpha, batch, n_cls, block_b):
    i = pl.program_id(0)

    @pl.when(i == 0)
    def _init():
        acc_rank_ref[...] = jnp.zeros_like(acc_rank_ref)
        acc_bce_ref[...] = jnp.zeros_like(acc_bce_ref)

    # global column (= batch) index of each lane in this tile, for masking padding
    col = i * block_b + lax.broadcasted_iota(jnp.int32, (1, block_b), 1)

    # ---- listwise rank loss over the E (sublane) axis -----------------------
    ps = ps_ref[...].astype(jnp.float32)                    # (E, BT)
    sc = sc_ref[...].astype(jnp.float32)                    # (E, BT)

    # numerically stable log_softmax pieces for pred_scores
    ps_max = jnp.max(ps, axis=0, keepdims=True)             # (1, BT)
    ps_shift = ps - ps_max
    log_z = jnp.log(jnp.sum(jnp.exp(ps_shift), axis=0, keepdims=True))  # (1, BT)

    # softmax(scores) with the divide folded out:
    #   -sum(sm * (ps_shift - log_z)) = log_z - sum(sc_exp * ps_shift) / sum(sc_exp)
    sc_max = jnp.max(sc, axis=0, keepdims=True)
    sc_exp = jnp.exp(sc - sc_max)
    denom = jnp.sum(sc_exp, axis=0, keepdims=True)          # (1, BT)
    inv_denom = pl.reciprocal(denom, approx=False)          # EUP slot
    weighted = jnp.sum(sc_exp * ps_shift, axis=0, keepdims=True)

    listwise = log_z - weighted * inv_denom                 # (1, BT) per-column loss
    rank_mask = (col < batch).astype(jnp.float32)
    acc_rank_ref[...] += jnp.sum(listwise * rank_mask, axis=1, keepdims=True)

    # ---- BCEWithLogits on the packed (2, BT) classification slab ------------
    cls = cls_ref[...].astype(jnp.float32)                  # (2, BT)
    x = cls[0:1, :]                                         # logits
    y = cls[1:2, :]                                         # targets
    bce = jnp.maximum(x, 0.0) - x * y + jnp.log1p(jnp.exp(-jnp.abs(x)))
    cls_mask = (col < n_cls).astype(jnp.float32)
    acc_bce_ref[...] += jnp.sum(bce * cls_mask, axis=1, keepdims=True)

    # ---- finalize ------------------------------------------------------------
    @pl.when(i == pl.num_programs(0) - 1)
    def _finalize():
        out_ref[...] = ((alpha / batch) * acc_rank_ref[...]
                        + (1.0 / n_cls) * acc_bce_ref[...])


def fact_checking_loss(pred_scores, pred_labels, scores, labels, *, alpha=0.0):
    """Pallas TPU implementation of FactCheckingLoss.forward.

    pred_scores, scores: (B, E)  -- may be bf16; upcast to f32 inside the kernel.
    pred_labels, labels: any shape with matching element count (flattened, mean
                         over all elements — same as torch BCEWithLogitsLoss).
    """
    pred_scores = jnp.asarray(pred_scores)
    scores = jnp.asarray(scores)
    B, E = pred_scores.shape

    pred_labels_f = jnp.asarray(pred_labels, jnp.float32).reshape(1, -1)
    labels_f = jnp.asarray(labels, jnp.float32).reshape(1, -1)
    assert pred_labels_f.shape == labels_f.shape, "pred_labels/labels size mismatch"
    N = pred_labels_f.shape[1]
    cls = jnp.concatenate([pred_labels_f, labels_f], axis=0)      # (2, N), lane-dense

    # lane-dense rank-loss layout: batch on lanes, E on sublanes
    ps_t = pred_scores.T                                          # (E, B)
    sc_t = scores.T                                               # (E, B)

    # tile the batch (lane) axis; pad to a multiple of the tile
    b_max = max(B, N)
    block_b = min(8192, pl.cdiv(b_max, 128) * 128)
    n_tiles = pl.cdiv(b_max, block_b)
    padded = n_tiles * block_b

    ps_t = jnp.pad(ps_t, ((0, 0), (0, padded - B)))
    sc_t = jnp.pad(sc_t, ((0, 0), (0, padded - B)))
    cls = jnp.pad(cls, ((0, 0), (0, padded - N)))

    kernel = functools.partial(
        _fact_checking_loss_kernel,
        alpha=float(alpha), batch=B, n_cls=N, block_b=block_b)

    cost = pl.CostEstimate(
        flops=12 * B * E + 8 * N,
        transcendentals=2 * B * E + B + 2 * N,
        bytes_accessed=int(pred_scores.size * pred_scores.dtype.itemsize
                           + scores.size * scores.dtype.itemsize
                           + 2 * N * 4 + 4),
    )

    out = pl.pallas_call(
        kernel,
        out_shape=jax.ShapeDtypeStruct((1, 1), jnp.float32),
        grid_spec=pltpu.PrefetchScalarGridSpec(
            num_scalar_prefetch=0,
            grid=(n_tiles,),
            in_specs=[
                pl.BlockSpec((E, block_b), lambda i: (0, i)),
                pl.BlockSpec((E, block_b), lambda i: (0, i)),
                pl.BlockSpec((2, block_b), lambda i: (0, i)),
            ],
            out_specs=pl.BlockSpec((1, 1), lambda i: (0, 0)),
            scratch_shapes=[pltpu.VMEM((1, 1), jnp.float32),   # rank-loss sum
                            pltpu.VMEM((1, 1), jnp.float32)],  # bce sum
        ),
        compiler_params=pltpu.CompilerParams(
            dimension_semantics=("arbitrary",)),
        cost_estimate=cost,
    )(ps_t, sc_t, cls)
    return out[0, 0]


def _reference(pred_scores, pred_labels, scores, labels, alpha):
    """Pure-JAX reference mirroring the PyTorch forward."""
    log_sm = jax.nn.log_softmax(pred_scores.astype(jnp.float32), axis=-1)
    sm = jax.nn.softmax(scores.astype(jnp.float32), axis=-1)
    rank_loss = jnp.mean(-jnp.sum(sm * log_sm, axis=-1))
    x = pred_labels.reshape(-1).astype(jnp.float32)
    y = labels.reshape(-1).astype(jnp.float32)
    bce = jnp.mean(jnp.maximum(x, 0.0) - x * y + jnp.log1p(jnp.exp(-jnp.abs(x))))
    return alpha * rank_loss + bce


if __name__ == "__main__":
    batch_size, evi_num = 2, 8
    alpha = 0.5  # __init__ arg (default 0); nonzero to exercise both loss terms

    key = jax.random.PRNGKey(0)
    k1, k2, k3, k4 = jax.random.split(key, 4)
    pred_scores = jax.random.normal(k1, (batch_size, evi_num), jnp.float32)
    scores = jax.random.normal(k2, (batch_size, evi_num), jnp.float32)
    pred_labels = jax.random.normal(k3, (batch_size, 1), jnp.float32)
    labels = (jax.random.uniform(k4, (batch_size, 1)) > 0.5).astype(jnp.float32)

    out = fact_checking_loss(pred_scores, pred_labels, scores, labels, alpha=alpha)
    out = jax.block_until_ready(out)

    ref = _reference(pred_scores, pred_labels, scores, labels, alpha)
    assert jnp.allclose(out, ref, rtol=1e-5, atol=1e-5), (out, ref)

    print("KERNEL_OK")
</pallas_src>

<mosaic_0001>
module attributes {stable_mosaic.version = 11 : i64} {
  func.func @_fact_checking_loss_kernel(%arg0: i32, %arg1: memref<8x128xf32, #tpu.memory_space<vmem>>, %arg2: memref<8x128xf32, #tpu.memory_space<vmem>>, %arg3: memref<2x128xf32, #tpu.memory_space<vmem>>, %arg4: memref<1x1xf32, #tpu.memory_space<vmem>>, %arg5: memref<1x1xf32, #tpu.memory_space<vmem>>, %arg6: memref<1x1xf32, #tpu.memory_space<vmem>>) attributes {dimension_semantics = [#tpu.dimension_semantics<arbitrary>], iteration_bounds = array<i64: 1>, scalar_prefetch = 0 : i64, scratch_operands = 2 : i64, tpu.core_type = #tpu.core_type<tc>, window_params = [{transform_indices = @transform_0, window_bounds = array<i64: 8, 128>}, {transform_indices = @transform_1, window_bounds = array<i64: 8, 128>}, {transform_indices = @transform_2, window_bounds = array<i64: 2, 128>}, {pipeline_mode = #tpu.pipeline_mode<synchronous>, transform_indices = @transform_3, window_bounds = array<i64: 1, 1>}]} {
    %c0_i32 = arith.constant 0 : i32
    %0 = arith.cmpi eq, %arg0, %c0_i32 : i32
    %1 = arith.extui %0 : i1 to i32
    %c0_i32_0 = arith.constant 0 : i32
    %2 = arith.cmpi ne, %1, %c0_i32_0 : i32
    scf.if %2 {
      %cst_25 = arith.constant 0.000000e+00 : f32
      %66 = vector.broadcast %cst_25 : f32 to vector<1x1xf32>
      %c0_26 = arith.constant 0 : index
      %c0_27 = arith.constant 0 : index
      %67 = vector.load %arg5[%c0_26, %c0_27] : memref<1x1xf32, #tpu.memory_space<vmem>>, vector<1x1xf32>
      tpu.vector_store %arg5[%c0_26, %c0_27], %66 {strides = array<i32>} : memref<1x1xf32, #tpu.memory_space<vmem>>, vector<1x1xf32>,
      %cst_28 = arith.constant 0.000000e+00 : f32
      %68 = vector.broadcast %cst_28 : f32 to vector<1x1xf32>
      %c0_29 = arith.constant 0 : index
      %c0_30 = arith.constant 0 : index
      %69 = vector.load %arg6[%c0_29, %c0_30] : memref<1x1xf32, #tpu.memory_space<vmem>>, vector<1x1xf32>
      tpu.vector_store %arg6[%c0_29, %c0_30], %68 {strides = array<i32>} : memref<1x1xf32, #tpu.memory_space<vmem>>, vector<1x1xf32>,
    } else {
    }
    %c128_i32 = arith.constant 128 : i32
    %3 = arith.muli %arg0, %c128_i32 : i32
    %4 = tpu.iota {dimensions = array<i32: 1>} : vector<1x128xi32>
    %5 = vector.broadcast %3 : i32 to vector<1x128xi32>
    %6 = arith.addi %5, %4 : vector<1x128xi32>
    %c0 = arith.constant 0 : index
    %c0_1 = arith.constant 0 : index
    %7 = vector.load %arg1[%c0, %c0_1] : memref<8x128xf32, #tpu.memory_space<vmem>>, vector<8x128xf32>
    %c0_2 = arith.constant 0 : index
    %c0_3 = arith.constant 0 : index
    %8 = vector.load %arg2[%c0_2, %c0_3] : memref<8x128xf32, #tpu.memory_space<vmem>>, vector<8x128xf32>
    %cst = arith.constant dense<0xFF800000> : vector<128xf32>
    %9 = vector.multi_reduction <maximumf>, %7, %cst [0] : vector<8x128xf32> to vector<128xf32>
    %10 = vector.shape_cast %9 : vector<128xf32> to vector<1x128xf32>
    %11 = vector.broadcast %10 : vector<1x128xf32> to vector<8x128xf32>
    %12 = arith.subf %7, %11 : vector<8x128xf32>
    %13 = math.exp %12 : vector<8x128xf32>
    %cst_4 = arith.constant dense<0.000000e+00> : vector<128xf32>
    %14 = vector.multi_reduction <add>, %13, %cst_4 [0] : vector<8x128xf32> to vector<128xf32>
    %15 = vector.shape_cast %14 : vector<128xf32> to vector<1x128xf32>
    %16 = math.log %15 : vector<1x128xf32>
    %cst_5 = arith.constant dense<0xFF800000> : vector<128xf32>
    %17 = vector.multi_reduction <maximumf>, %8, %cst_5 [0] : vector<8x128xf32> to vector<128xf32>
    %18 = vector.shape_cast %17 : vector<128xf32> to vector<1x128xf32>
    %19 = vector.broadcast %18 : vector<1x128xf32> to vector<8x128xf32>
    %20 = arith.subf %8, %19 : vector<8x128xf32>
    %21 = math.exp %20 : vector<8x128xf32>
    %cst_6 = arith.constant dense<0.000000e+00> : vector<128xf32>
    %22 = vector.multi_reduction <add>, %21, %cst_6 [0] : vector<8x128xf32> to vector<128xf32>
    %23 = vector.shape_cast %22 : vector<128xf32> to vector<1x128xf32>
    %24 = tpu.reciprocal %23 : vector<1x128xf32> -> vector<1x128xf32>
    %25 = arith.mulf %21, %12 : vector<8x128xf32>
    %cst_7 = arith.constant dense<0.000000e+00> : vector<128xf32>
    %26 = vector.multi_reduction <add>, %25, %cst_7 [0] : vector<8x128xf32> to vector<128xf32>
    %27 = vector.shape_cast %26 : vector<128xf32> to vector<1x128xf32>
    %28 = arith.mulf %27, %24 : vector<1x128xf32>
    %29 = arith.subf %16, %28 : vector<1x128xf32>
    %c2_i32 = arith.constant 2 : i32
    %30 = vector.broadcast %c2_i32 : i32 to vector<1x128xi32>
    %31 = arith.cmpi slt, %6, %30 : vector<1x128xi32>
    %32 = arith.extui %31 : vector<1x128xi1> to vector<1x128xi32>
    %33 = arith.sitofp %32 : vector<1x128xi32> to vector<1x128xf32>
    %c0_8 = arith.constant 0 : index
    %c0_9 = arith.constant 0 : index
    %34 = vector.load %arg5[%c0_8, %c0_9] : memref<1x1xf32, #tpu.memory_space<vmem>>, vector<1x1xf32>
    %35 = arith.mulf %29, %33 : vector<1x128xf32>
    %cst_10 = arith.constant dense<0.000000e+00> : vector<1xf32>
    %36 = vector.multi_reduction <add>, %35, %cst_10 [1] : vector<1x128xf32> to vector<1xf32>
    %37 = vector.shape_cast %36 : vector<1xf32> to vector<1x1xf32>
    %38 = arith.addf %34, %37 : vector<1x1xf32>
    %c0_11 = arith.constant 0 : index
    %c0_12 = arith.constant 0 : index
    %39 = vector.load %arg5[%c0_11, %c0_12] : memref<1x1xf32, #tpu.memory_space<vmem>>, vector<1x1xf32>
    tpu.vector_store %arg5[%c0_11, %c0_12], %38 {strides = array<i32>} : memref<1x1xf32, #tpu.memory_space<vmem>>, vector<1x1xf32>,
    %c0_13 = arith.constant 0 : index
    %c0_14 = arith.constant 0 : index
    %40 = vector.load %arg3[%c0_13, %c0_14] : memref<2x128xf32, #tpu.memory_space<vmem>>, vector<2x128xf32>
    %41 = vector.extract_strided_slice %40 {offsets = [0, 0], sizes = [1, 128], strides = [1, 1]} : vector<2x128xf32> to vector<1x128xf32>
    %42 = vector.extract_strided_slice %40 {offsets = [1, 0], sizes = [1, 128], strides = [1, 1]} : vector<2x128xf32> to vector<1x128xf32>
    %cst_15 = arith.constant 0.000000e+00 : f32
    %43 = vector.broadcast %cst_15 : f32 to vector<1x128xf32>
    %44 = arith.maximumf %41, %43 : vector<1x128xf32>
    %45 = arith.mulf %41, %42 : vector<1x128xf32>
    %46 = arith.subf %44, %45 : vector<1x128xf32>
    %47 = math.absf %41 : vector<1x128xf32>
    %cst_16 = arith.constant 0.000000e+00 : f32
    %48 = vector.broadcast %cst_16 : f32 to vector<1x128xf32>
    %49 = arith.subf %48, %47 : vector<1x128xf32>
    %50 = math.exp %49 : vector<1x128xf32>
    %51 = math.log1p %50 : vector<1x128xf32>
    %52 = arith.addf %46, %51 : vector<1x128xf32>
    %c2_i32_17 = arith.constant 2 : i32
    %53 = vector.broadcast %c2_i32_17 : i32 to vector<1x128xi32>
    %54 = arith.cmpi slt, %6, %53 : vector<1x128xi32>
    %55 = arith.extui %54 : vector<1x128xi1> to vector<1x128xi32>
    %56 = arith.sitofp %55 : vector<1x128xi32> to vector<1x128xf32>
    %c0_18 = arith.constant 0 : index
    %c0_19 = arith.constant 0 : index
    %57 = vector.load %arg6[%c0_18, %c0_19] : memref<1x1xf32, #tpu.memory_space<vmem>>, vector<1x1xf32>
    %58 = arith.mulf %52, %56 : vector<1x128xf32>
    %cst_20 = arith.constant dense<0.000000e+00> : vector<1xf32>
    %59 = vector.multi_reduction <add>, %58, %cst_20 [1] : vector<1x128xf32> to vector<1xf32>
    %60 = vector.shape_cast %59 : vector<1xf32> to vector<1x1xf32>
    %61 = arith.addf %57, %60 : vector<1x1xf32>
    %c0_21 = arith.constant 0 : index
    %c0_22 = arith.constant 0 : index
    %62 = vector.load %arg6[%c0_21, %c0_22] : memref<1x1xf32, #tpu.memory_space<vmem>>, vector<1x1xf32>
    tpu.vector_store %arg6[%c0_21, %c0_22], %61 {strides = array<i32>} : memref<1x1xf32, #tpu.memory_space<vmem>>, vector<1x1xf32>,
    %c0_i32_23 = arith.constant 0 : i32
    %63 = arith.cmpi eq, %arg0, %c0_i32_23 : i32
    %64 = arith.extui %63 : i1 to i32
    %c0_i32_24 = arith.constant 0 : i32
    %65 = arith.cmpi ne, %64, %c0_i32_24 : i32
    scf.if %65 {
      %c0_25 = arith.constant 0 : index
      %c0_26 = arith.constant 0 : index
      %66 = vector.load %arg5[%c0_25, %c0_26] : memref<1x1xf32, #tpu.memory_space<vmem>>, vector<1x1xf32>
      %cst_27 = arith.constant 2.500000e-01 : f32
      %67 = vector.broadcast %cst_27 : f32 to vector<1x1xf32>
      %68 = arith.mulf %67, %66 : vector<1x1xf32>
      %c0_28 = arith.constant 0 : index
      %c0_29 = arith.constant 0 : index
      %69 = vector.load %arg6[%c0_28, %c0_29] : memref<1x1xf32, #tpu.memory_space<vmem>>, vector<1x1xf32>
      %cst_30 = arith.constant 5.000000e-01 : f32
      %70 = vector.broadcast %cst_30 : f32 to vector<1x1xf32>
      %71 = arith.mulf %70, %69 : vector<1x1xf32>
      %72 = arith.addf %68, %71 : vector<1x1xf32>
      %c0_31 = arith.constant 0 : index
      %c0_32 = arith.constant 0 : index
      %73 = vector.load %arg4[%c0_31, %c0_32] : memref<1x1xf32, #tpu.memory_space<vmem>>, vector<1x1xf32>
      tpu.vector_store %arg4[%c0_31, %c0_32], %72 {strides = array<i32>} : memref<1x1xf32, #tpu.memory_space<vmem>>, vector<1x1xf32>,
    } else {
    }
    return
  }
  func.func @transform_0(%arg0: i32) -> (i32, i32) {
    %c0_i32 = arith.constant 0 : i32
    %c0_i32_0 = arith.constant 0 : i32
    return %c0_i32, %arg0 : i32, i32
  }
  func.func @transform_1(%arg0: i32) -> (i32, i32) {
    %c0_i32 = arith.constant 0 : i32
    %c0_i32_0 = arith.constant 0 : i32
    return %c0_i32, %arg0 : i32, i32
  }
  func.func @transform_2(%arg0: i32) -> (i32, i32) {
    %c0_i32 = arith.constant 0 : i32
    %c0_i32_0 = arith.constant 0 : i32
    return %c0_i32, %arg0 : i32, i32
  }
  func.func @transform_3(%arg0: i32) -> (i32, i32) {
    %c0_i32 = arith.constant 0 : i32
    %c0_i32_0 = arith.constant 0 : i32
    %c0_i32_1 = arith.constant 0 : i32
    return %c0_i32, %c0_i32_0 : i32, i32
  }
}

</mosaic_0001>

<bundles_post_ra>
// kernel: tpu_custom_call.1
= control target key start
LH: loop header
LB: loop body
LE: loop exit
PB: predicated region body
PF: predicated region fallthrough
CT: control target
= control target key end

     0   :  { %8 = vsyncpa [#allocation5], 0  ;;  %s286_s0 = inlined_call_operand.hbm [shape: f32[8,128], index: 0, kind: input, shape index: {}]   ;;  %s287_s1 = inlined_call_operand.hbm [shape: f32[8,128], index: 1, kind: input, shape index: {}]   ;;  %s288_s2 = inlined_call_operand.vmem [shape: f32[2,128], index: 2, kind: input, shape index: {}]   ;;  %s289_s3 = inlined_call_operand.hbm [shape: f32[1,1], index: 3, kind: output, shape index: {}]  }
   0x1   :  { %9 = vsyncpa [#allocation8], 0 }
   0x2   :  { %10 = vsyncpa [#allocation6], 0  ;;  %s242_s12 = smov [#allocation4]   ;;  %s243_s14 = smov [#allocation7]  }
   0x3   :  { %s17_s13 = sshll.u32 %s242_s12, 4  ;;  %s27_s15 = sshll.u32 %s243_s14, 4  ;;  %s18_s13 = int_to_ptr.vmem [resolvable:$true] %s17_s13  ;;  %s28_s15 = int_to_ptr.vmem [resolvable:$true] %s27_s15 }
   0x4   :  { %s184_s16 = scalar_lea.vmem %s18_s13, 128  ;;  %p189_p1 = scmp.lt.s32.totalorder %s18_s13, %s18_s13 }
   0x5   :  { %p185_p0 = scmp.ne.s32.totalorder %s18_s13, %s184_s16  ;;  %p190_p2 = scmp.lt.s32.totalorder %s184_s16, %s184_s16 }
   0x7   :  { %p191_p3 = por %p190_p2, %p189_p1 }
   0x9   :  { %p192_p4 = pnand %p191_p3, %p185_p0 }
   0xb   :  { %195 = shalt.err (!%p192_p4)
}
   0xc   :  { %20 = dma.hbm_to_vmem [thread:$0]  %s286_s0, 128, %s18_s13, [#allocation5]  }
   0xd   :  { %s204_s19 = scalar_lea.vmem %s28_s15, 128  ;;  %p209_p6 = scmp.lt.s32.totalorder %s28_s15, %s28_s15 }
   0xe   :  { %p205_p5 = scmp.ne.s32.totalorder %s28_s15, %s204_s19  ;;  %p210_p7 = scmp.lt.s32.totalorder %s204_s19, %s204_s19 }
  0x10   :  { %p211_p8 = por %p210_p7, %p209_p6 }
  0x12   :  { %p212_p9 = pnand %p211_p8, %p205_p5 }
  0x14   :  { %215 = shalt.err (!%p212_p9)
}
  0x15   :  { %30 = dma.hbm_to_vmem [thread:$0]  %s287_s1, 128, %s28_s15, [#allocation8]  }
  0x16   :  { %236 = dma.done.wait [#allocation5], 128  }
  0x17   :  { %237 = vsyncadd [#allocation5], 4294967168 }
  0x18   :  { %238 = dma.done.wait [#allocation8], 128  }
  0x19   :  { %239 = vsyncadd [#allocation8], 4294967168  ;;  %vm43_vm0 = vcmask 0   ;;  %v244_v0 = vmov 0.0   ;;  %v51_v1 = vld [vmem:[#allocation4] sm:$0xff]  ;;  %v52_v2 = vld [vmem:[#allocation7] sm:$0xff]  ;;  %v47_v49 = vlaneseq }
  0x1a   :  { %44 = vst.msk [vmem:[#allocation2] sm:$0x1] %vm43_vm0, %v244_v0  ;;  %45 = vst.msk [vmem:[#allocation3] sm:$0x1] %vm43_vm0, %v244_v0  ;;  %v105_v3 = vld [vmem:[%s288_s2] sm:$0x3] }
  0x1b   :  { %v53_v4 = vrot.slane %v51_v1, 4  ;;  %v70_v5 = vrot.slane %v52_v2, 4  ;;  %v112_v6 = vand.u32 2147483647, %v105_v3  ;;  %v108_v44 = vrot.slane %v105_v3, 1  ;;  %s245_s1 = smov [#allocation9]  }
  0x1c   :  { %v106_v50 = vmax.f32 %v105_v3, 0.0  ;;  %v48_v55 = vand.u32 127, %v47_v49  ;;  %vm128_vm3 = vcmask 1040384   ;;  %s149_s2 = sshll.u32 %s245_s1, 4  ;;  %s150_s2 = int_to_ptr.vmem [resolvable:$true] %s149_s2 }
  0x1d   :  { %v54_v7 = vmax.f32 %v51_v1, %v53_v4  ;;  %v71_v8 = vmax.f32 %v52_v2, %v70_v5  ;;  %v113_v11 = vsub.f32 0.0, %v112_v6  ;;  %v110_v51 = vmul.f32 %v108_v44, %v105_v3  ;;  %s216_s23 = scalar_lea.vmem %s150_s2, 16  ;;  %s220_s24 = scalar_lea.vmem %s150_s2, 32 }
  0x1e   :  { %vm95_vm2 = vcmp.lt.s32.totalorder %v48_v55, 2  ;;  %p217_p10 = scmp.ne.s32.totalorder %s150_s2, %s216_s23  ;;  %p221_p11 = scmp.lt.s32.totalorder %s150_s2, %s150_s2 }
  0x1f   :  { %v55_v9 = vrot.slane %v54_v7, 2  ;;  %v72_v10 = vrot.slane %v71_v8, 2  ;;  %v114_v16 = vmul.f32 1.442695, %v113_v11  ;;  %v111_v56 = vsub.f32 %v106_v50, %v110_v51  ;;  %p222_p12 = scmp.lt.s32.totalorder %s220_s24, %s216_s23 }
  0x21   :  { %v56_v12 = vmax.f32 %v54_v7, %v55_v9  ;;  %v73_v13 = vmax.f32 %v71_v8, %v72_v10  ;;  %164 = vpow2.f32 %v114_v16  ;;  %v98_v6 = vld [vmem:[#allocation2] sm:$0x1]  ;;  %v126_v9 = vld [vmem:[#allocation3] sm:$0x1]  ;;  %p223_p13 = por %p222_p12, %p221_p11 }
  0x23   :  { %v57_v14 = vrot.slane %v56_v12, 1  ;;  %v74_v15 = vrot.slane %v73_v13, 1  ;;  %p224_p0 = pnand %p223_p13, %p217_p10 }
  0x25   :  { %v58_v17 = vmax.f32 %v56_v12, %v57_v14  ;;  %v75_v18 = vmax.f32 %v73_v13, %v74_v15 }
  0x27   :  { %v59_v19 = vsub.f32 %v51_v1, %v58_v17  ;;  %v76_v20 = vsub.f32 %v52_v2, %v75_v18  ;;  %v159_v1 = vsel %vm95_vm2, 1.0, %v244_v0 }
  0x29   :  { %v60_v21 = vmul.f32 1.442695, %v59_v19  ;;  %v77_v22 = vmul.f32 1.442695, %v76_v20 }
  0x2b   :  { %166 = vpow2.f32 %v60_v21 }
  0x2c   :  { %168 = vpow2.f32 %v77_v22 }
  0x2e   :  { %v165_v23 = vpop.eup %164 }
  0x2f   :  { %v116_v25 = vadd.f32 1.0, %v165_v23  ;;  %v119_v43 = vmul.f32 -0.5, %v165_v23  ;;  %v122_v48 = vand.u32 2147483647, %v165_v23 }
  0x31   :  { %170 = vlog2.f32 %v116_v25  ;;  %v120_v46 = vadd.f32 1.0, %v119_v43  ;;  %vm123_vm1 = vcmp.lt.f32.partialorder %v122_v48, 0.0004427343 }
  0x33   :  { %v121_v54 = vmul.f32 %v165_v23, %v120_v46 }
  0x38   :  { %v167_v24 = vpop.eup %166 }
  0x39   :  { %v169_v26 = vpop.eup %168  ;;  %v62_v27 = vrot.slane %v167_v24, 4 }
  0x3a   :  { %v79_v28 = vrot.slane %v169_v26, 4  ;;  %v86_v29 = vmul.f32 %v169_v26, %v59_v19 }
  0x3b   :  { %v63_v30 = vadd.f32 %v167_v24, %v62_v27 }
  0x3c   :  { %v80_v31 = vadd.f32 %v169_v26, %v79_v28  ;;  %v87_v32 = vrot.slane %v86_v29, 4 }
  0x3d   :  { %v64_v33 = vrot.slane %v63_v30, 2 }
  0x3e   :  { %v81_v34 = vrot.slane %v80_v31, 2  ;;  %v88_v37 = vadd.f32 %v87_v32, %v86_v29  ;;  %v171_v47 = vpop.eup %170 }
  0x3f   :  { %v65_v35 = vadd.f32 %v64_v33, %v63_v30  ;;  %v118_v53 = vmul.f32 0.6931472, %v171_v47 }
  0x40   :  { %v82_v36 = vadd.f32 %v81_v34, %v80_v31  ;;  %v89_v42 = vrot.slane %v88_v37, 2 }
  0x41   :  { %v66_v38 = vrot.slane %v65_v35, 1  ;;  %v124_v58 = vsel %vm123_vm1, %v121_v54, %v118_v53 }
  0x42   :  { %v83_v39 = vrot.slane %v82_v36, 1  ;;  %v90_v45 = vadd.f32 %v89_v42, %v88_v37  ;;  %v125_v62 = vadd.f32 %v124_v58, %v111_v56 }
  0x43   :  { %v67_v40 = vadd.f32 %v66_v38, %v65_v35 }
  0x44   :  { %v84_v41 = vadd.f32 %v83_v39, %v82_v36  ;;  %v91_v52 = vrot.slane %v90_v45, 1  ;;  %v127_v4 = vmul.f32 %v159_v1, %v125_v62 }
  0x45   :  { %172 = vlog2.f32 %v67_v40 }
  0x46   :  { %174 = vrcp.f32 %v84_v41  ;;  %v92_v57 = vadd.f32 %v91_v52, %v90_v45  ;;  %v129_v3 = vsel %vm128_vm3, %v127_v4, 0.0 }
  0x52   :  { %v173_v59 = vpop.eup %172 }
  0x53   :  { %v175_v60 = vpop.eup %174  ;;  %v69_v61 = vmul.f32 0.6931472, %v173_v59 }
  0x54   :  { %v93_v63 = vmul.f32 %v175_v60, %v92_v57 }
  0x56   :  { %v94_v2 = vsub.f32 %v69_v61, %v93_v63 }
  0x58   :  { %v99_v5 = vmul.f32 %v159_v1, %v94_v2 }
  0x5a   :  { %100 = vadd.xlane.f32.xlu0 %v99_v5 }
  0x5e   :  { %130 = vadd.xlane.f32.xlu0 %v129_v3 }
  0xe3   :  { %v101_v7 = vpop.xlane.xlu0 %100 }
  0xe4   :  { %v102_v8 = vadd.f32 %v101_v7, %v98_v6 }
  0xe6   :  { %104 = vst.msk [vmem:[#allocation2] sm:$0x1] %vm43_vm0, %v102_v8 }
  0xe7   :  { %v131_v10 = vpop.xlane.xlu0 %130 }
  0xe8   :  { %v132_v11 = vadd.f32 %v131_v10, %v126_v9 }
  0xea   :  { %133 = vst.msk [vmem:[#allocation3] sm:$0x1] %vm43_vm0, %v132_v11 }
  0xed   :  { %v137_v12 = vld [vmem:[#allocation2] sm:$0x1] }
  0xee   :  { %v138_v0 = vmul.f32 0.25, %v137_v12 }
  0xf1   :  { %v139_v13 = vld [vmem:[#allocation3] sm:$0x1] }
  0xf2   :  { %v140_v14 = vmul.f32 0.5, %v139_v13 }
  0xf4   :  { %v141_v15 = vadd.f32 %v140_v14, %v138_v0 }
  0xf6   :  { %142 = vst.msk [vmem:[#allocation9] sm:$0x1] %vm43_vm0, %v141_v15 }
  0xf7   :  { %227 = shalt.err (!%p224_p0)
}
  0xf8   :  { %152 = dma.vmem_to_hbm [thread:$0]  %s150_s2, 16, %s289_s3, [#allocation6]  }
  0xf9   :  { %240 = dma.done.wait [#allocation6], 16  }
  0xfa   :  { %241 = vsyncadd [#allocation6], 4294967280 }
  0xfb   :  { %156 = vsyncpa [#allocation5], 1 }
  0xfc   :  { %157 = vsyncpa [#allocation8], 1 }
  0xfd   :  { %158 = vsyncpa [#allocation6], 1 }

</bundles_post_ra>
